<compile_context>
chip_gen: v7x
topology: tpu7x:2x2x1
jax: 0.10.0
libtpu: 0.0.40
codegen_flags: <defaults>
</compile_context>

<pallas_src>
import jax
import jax.numpy as jnp
from jax.experimental import pallas as pl
from jax.experimental.pallas import tpu as pltpu


def _map_kernel(logits_ref, target_ref, inter_ref, union_ref):
    i = pl.program_id(0)

    @pl.when(i == 0)
    def _():
        inter_ref[...] = jnp.zeros_like(inter_ref)
        union_ref[...] = jnp.zeros_like(union_ref)

    x = logits_ref[...]                      # (C, T) f32, channels on sublanes
    t1 = target_ref[...] == 1                # (1, T) bool

    # argmax(softmax(x)) == argmax(x); "argmax over channels == 1" with
    # first-index-wins tie-breaking (matches torch.max):
    #   class 1 wins iff x[1] > x[0]  and  x[1] >= max(x[2:]).
    c = x.shape[0]
    if c >= 2:
        pred1 = x[1:2, :] > x[0:1, :]
        if c > 2:
            pred1 = jnp.logical_and(
                pred1, x[1:2, :] >= jnp.max(x[2:, :], axis=0, keepdims=True))
    else:
        pred1 = jnp.zeros_like(t1)           # no class 1 -> never predicted

    inter = jnp.logical_and(t1, pred1)
    union = jnp.logical_or(t1, pred1)

    inter_ref[...] = inter_ref[...] + jnp.sum(inter.astype(jnp.float32))
    union_ref[...] = union_ref[...] + jnp.sum(union.astype(jnp.float32))


def map_forward(inp, target):
    """JAX/Pallas equivalent of mAP.forward(input, target)."""
    n, c, h, w = inp.shape
    nt, ht, wt = target.shape

    # center-crop of the target (plain-JAX glue, mirrors mAP.crop exactly)
    offset_w, offset_h = (wt - w) // 2, (ht - h) // 2
    if offset_w > 0 and offset_h > 0:
        target = target[:, offset_h:-offset_h, offset_w:-offset_w]

    hw = h * w
    total = n * hw

    # channels -> sublanes, all pixels of all samples -> lanes
    logits = jnp.transpose(inp.astype(jnp.float32), (1, 0, 2, 3)).reshape(c, total)
    tgt = target.reshape(1, total).astype(jnp.int32)

    # samples per grid step: largest divisor of n whose (double-buffered) block
    # fits a ~2 MiB budget (sized against v7x's 64 MiB VMEM; trivially fits
    # v5e/v6e as well).
    bytes_per_sample = (c + 1) * hw * 4
    b = max(1, min(n, (2 * 1024 * 1024) // max(bytes_per_sample, 1)))
    while n % b:
        b -= 1
    tile = b * hw
    # lane tile must be a multiple of 128 or cover the whole axis
    if tile != total and tile % 128 != 0:
        b, tile = n, total
    grid = (n // b,)

    inter, union = pl.pallas_call(
        _map_kernel,
        out_shape=(jax.ShapeDtypeStruct((1, 1), jnp.float32),
                   jax.ShapeDtypeStruct((1, 1), jnp.float32)),
        grid_spec=pltpu.PrefetchScalarGridSpec(
            num_scalar_prefetch=0,
            grid=grid,
            in_specs=[pl.BlockSpec((c, tile), lambda i: (0, i)),
                      pl.BlockSpec((1, tile), lambda i: (0, i))],
            out_specs=(pl.BlockSpec((1, 1), lambda i: (0, 0)),
                       pl.BlockSpec((1, 1), lambda i: (0, 0)))),
        compiler_params=pltpu.CompilerParams(
            dimension_semantics=("arbitrary",)),
    )(logits, tgt)

    inter_s = inter[0, 0]
    union_s = union[0, 0]
    # jaccard edge case: union == 0 implies intersection == 0 -> IoU = 1
    safe_union = jnp.where(union_s == 0, jnp.float32(1.0), union_s)
    iou = jnp.where(union_s == 0, jnp.float32(1.0), inter_s / safe_union)
    return jnp.reshape(iou, (1,))


if __name__ == "__main__":
    key = jax.random.PRNGKey(0)
    k1, k2 = jax.random.split(key)
    # input: (N, C, H, W) logits; target: (NT, HT, WT) class labels (cropped to H, W)
    x = jax.random.normal(k1, (2, 4, 16, 16), dtype=jnp.float32)
    target = jax.random.randint(k2, (2, 20, 20), 0, 4, dtype=jnp.int32)

    iou = map_forward(x, target)
    jax.block_until_ready(iou)
    print("KERNEL_OK")
</pallas_src>

<mosaic_0001>
module attributes {stable_mosaic.version = 11 : i64} {
  func.func @_map_kernel(%arg0: i32, %arg1: memref<4x512xf32, #tpu.memory_space<vmem>>, %arg2: memref<1x512xi32, #tpu.memory_space<vmem>>, %arg3: memref<1x1xf32, #tpu.memory_space<vmem>>, %arg4: memref<1x1xf32, #tpu.memory_space<vmem>>) attributes {dimension_semantics = [#tpu.dimension_semantics<arbitrary>], iteration_bounds = array<i64: 1>, scalar_prefetch = 0 : i64, scratch_operands = 0 : i64, tpu.core_type = #tpu.core_type<tc>, window_params = [{transform_indices = @transform_0, window_bounds = array<i64: 4, 512>}, {transform_indices = @transform_1, window_bounds = array<i64: 1, 512>}, {pipeline_mode = #tpu.pipeline_mode<synchronous>, transform_indices = @transform_2, window_bounds = array<i64: 1, 1>}, {pipeline_mode = #tpu.pipeline_mode<synchronous>, transform_indices = @transform_3, window_bounds = array<i64: 1, 1>}]} {
    %c0_i32 = arith.constant 0 : i32
    %0 = arith.cmpi eq, %arg0, %c0_i32 : i32
    %1 = arith.extui %0 : i1 to i32
    %c0_i32_0 = arith.constant 0 : i32
    %2 = arith.cmpi ne, %1, %c0_i32_0 : i32
    scf.if %2 {
      %cst_14 = arith.constant 0.000000e+00 : f32
      %38 = vector.broadcast %cst_14 : f32 to vector<1x1xf32>
      %c0_15 = arith.constant 0 : index
      %c0_16 = arith.constant 0 : index
      %39 = vector.load %arg3[%c0_15, %c0_16] : memref<1x1xf32, #tpu.memory_space<vmem>>, vector<1x1xf32>
      tpu.vector_store %arg3[%c0_15, %c0_16], %38 {strides = array<i32>} : memref<1x1xf32, #tpu.memory_space<vmem>>, vector<1x1xf32>,
      %cst_17 = arith.constant 0.000000e+00 : f32
      %40 = vector.broadcast %cst_17 : f32 to vector<1x1xf32>
      %c0_18 = arith.constant 0 : index
      %c0_19 = arith.constant 0 : index
      %41 = vector.load %arg4[%c0_18, %c0_19] : memref<1x1xf32, #tpu.memory_space<vmem>>, vector<1x1xf32>
      tpu.vector_store %arg4[%c0_18, %c0_19], %40 {strides = array<i32>} : memref<1x1xf32, #tpu.memory_space<vmem>>, vector<1x1xf32>,
    } else {
    }
    %c0 = arith.constant 0 : index
    %c0_1 = arith.constant 0 : index
    %3 = vector.load %arg1[%c0, %c0_1] : memref<4x512xf32, #tpu.memory_space<vmem>>, vector<4x512xf32>
    %c0_2 = arith.constant 0 : index
    %c0_3 = arith.constant 0 : index
    %4 = vector.load %arg2[%c0_2, %c0_3] : memref<1x512xi32, #tpu.memory_space<vmem>>, vector<1x512xi32>
    %c1_i32 = arith.constant 1 : i32
    %5 = vector.broadcast %c1_i32 : i32 to vector<1x512xi32>
    %6 = arith.cmpi eq, %4, %5 : vector<1x512xi32>
    %7 = vector.extract_strided_slice %3 {offsets = [1, 0], sizes = [1, 512], strides = [1, 1]} : vector<4x512xf32> to vector<1x512xf32>
    %8 = vector.extract_strided_slice %3 {offsets = [0, 0], sizes = [1, 512], strides = [1, 1]} : vector<4x512xf32> to vector<1x512xf32>
    %9 = arith.cmpf ogt, %7, %8 : vector<1x512xf32>
    %10 = vector.extract_strided_slice %3 {offsets = [1, 0], sizes = [1, 512], strides = [1, 1]} : vector<4x512xf32> to vector<1x512xf32>
    %11 = vector.extract_strided_slice %3 {offsets = [2, 0], sizes = [2, 512], strides = [1, 1]} : vector<4x512xf32> to vector<2x512xf32>
    %cst = arith.constant dense<0xFF800000> : vector<512xf32>
    %12 = vector.multi_reduction <maximumf>, %11, %cst [0] : vector<2x512xf32> to vector<512xf32>
    %13 = vector.shape_cast %12 : vector<512xf32> to vector<1x512xf32>
    %14 = arith.cmpf oge, %10, %13 : vector<1x512xf32>
    %15 = arith.andi %9, %14 : vector<1x512xi1>
    %16 = arith.andi %6, %15 : vector<1x512xi1>
    %17 = arith.ori %6, %15 : vector<1x512xi1>
    %c0_4 = arith.constant 0 : index
    %c0_5 = arith.constant 0 : index
    %18 = vector.load %arg3[%c0_4, %c0_5] : memref<1x1xf32, #tpu.memory_space<vmem>>, vector<1x1xf32>
    %19 = arith.extui %16 : vector<1x512xi1> to vector<1x512xi32>
    %20 = arith.sitofp %19 : vector<1x512xi32> to vector<1x512xf32>
    %21 = vector.shape_cast %20 : vector<1x512xf32> to vector<1x1x512xf32>
    %cst_6 = arith.constant dense<0.000000e+00> : vector<1xf32>
    %22 = vector.multi_reduction <add>, %21, %cst_6 [1, 2] : vector<1x1x512xf32> to vector<1xf32>
    %23 = vector.shape_cast %22 : vector<1xf32> to vector<1x1x1xf32>
    %24 = vector.extract %23[0, 0, 0] : f32 from vector<1x1x1xf32>
    %25 = vector.broadcast %24 : f32 to vector<1x1xf32>
    %26 = arith.addf %18, %25 : vector<1x1xf32>
    %c0_7 = arith.constant 0 : index
    %c0_8 = arith.constant 0 : index
    %27 = vector.load %arg3[%c0_7, %c0_8] : memref<1x1xf32, #tpu.memory_space<vmem>>, vector<1x1xf32>
    tpu.vector_store %arg3[%c0_7, %c0_8], %26 {strides = array<i32>} : memref<1x1xf32, #tpu.memory_space<vmem>>, vector<1x1xf32>,
    %c0_9 = arith.constant 0 : index
    %c0_10 = arith.constant 0 : index
    %28 = vector.load %arg4[%c0_9, %c0_10] : memref<1x1xf32, #tpu.memory_space<vmem>>, vector<1x1xf32>
    %29 = arith.extui %17 : vector<1x512xi1> to vector<1x512xi32>
    %30 = arith.sitofp %29 : vector<1x512xi32> to vector<1x512xf32>
    %31 = vector.shape_cast %30 : vector<1x512xf32> to vector<1x1x512xf32>
    %cst_11 = arith.constant dense<0.000000e+00> : vector<1xf32>
    %32 = vector.multi_reduction <add>, %31, %cst_11 [1, 2] : vector<1x1x512xf32> to vector<1xf32>
    %33 = vector.shape_cast %32 : vector<1xf32> to vector<1x1x1xf32>
    %34 = vector.extract %33[0, 0, 0] : f32 from vector<1x1x1xf32>
    %35 = vector.broadcast %34 : f32 to vector<1x1xf32>
    %36 = arith.addf %28, %35 : vector<1x1xf32>
    %c0_12 = arith.constant 0 : index
    %c0_13 = arith.constant 0 : index
    %37 = vector.load %arg4[%c0_12, %c0_13] : memref<1x1xf32, #tpu.memory_space<vmem>>, vector<1x1xf32>
    tpu.vector_store %arg4[%c0_12, %c0_13], %36 {strides = array<i32>} : memref<1x1xf32, #tpu.memory_space<vmem>>, vector<1x1xf32>,
    return
  }
  func.func @transform_0(%arg0: i32) -> (i32, i32) {
    %c0_i32 = arith.constant 0 : i32
    %c0_i32_0 = arith.constant 0 : i32
    return %c0_i32, %arg0 : i32, i32
  }
  func.func @transform_1(%arg0: i32) -> (i32, i32) {
    %c0_i32 = arith.constant 0 : i32
    %c0_i32_0 = arith.constant 0 : i32
    return %c0_i32, %arg0 : i32, i32
  }
  func.func @transform_2(%arg0: i32) -> (i32, i32) {
    %c0_i32 = arith.constant 0 : i32
    %c0_i32_0 = arith.constant 0 : i32
    %c0_i32_1 = arith.constant 0 : i32
    return %c0_i32, %c0_i32_0 : i32, i32
  }
  func.func @transform_3(%arg0: i32) -> (i32, i32) {
    %c0_i32 = arith.constant 0 : i32
    %c0_i32_0 = arith.constant 0 : i32
    %c0_i32_1 = arith.constant 0 : i32
    return %c0_i32, %c0_i32_0 : i32, i32
  }
}

</mosaic_0001>

<bundles_post_ra>
// kernel: tpu_custom_call.1
= control target key start
LH: loop header
LB: loop body
LE: loop exit
PB: predicated region body
PF: predicated region fallthrough
CT: control target
= control target key end

     0   :  { %9 = vsyncpa [#allocation3], 0  ;;  %s452_s0 = inlined_call_operand.hbm [shape: f32[4,512], index: 0, kind: input, shape index: {}]   ;;  %s453_s1 = inlined_call_operand.hbm [shape: s32[1,512], index: 1, kind: input, shape index: {}]   ;;  %s454_s2 = inlined_call_operand.hbm [shape: f32[1,1], index: 2, kind: output, shape index: {0}]   ;;  %s455_s3 = inlined_call_operand.hbm [shape: f32[1,1], index: 3, kind: output, shape index: {1}]  }
   0x1   :  { %10 = vsyncpa [#allocation6], 0 }
   0x2   :  { %11 = vsyncpa [#allocation4], 0 }
   0x3   :  { %12 = vsyncpa [#allocation9], 0  ;;  %s361_s12 = smov [#allocation2]   ;;  %s362_s14 = smov [#allocation5]  }
   0x4   :  { %s19_s13 = sshll.u32 %s361_s12, 4  ;;  %s29_s15 = sshll.u32 %s362_s14, 4  ;;  %s20_s13 = int_to_ptr.vmem [resolvable:$true] %s19_s13  ;;  %s30_s15 = int_to_ptr.vmem [resolvable:$true] %s29_s15 }
   0x5   :  { %s265_s18 = scalar_lea.hbm %s452_s0, 256 }
   0x6   :  { %p266_p0 = scmp.ne.s32.totalorder %s452_s0, %s265_s18  ;;  %p269_p1 = scmp.lt.u32.totalorder %s265_s18, %s452_s0 }
   0x8   :  { %p271_p2 = pnand %p269_p1, %p266_p0 }
   0xa   :  { %274 = shalt.err (!%p271_p2)
}
   0xb   :  { %s275_s23 = scalar_lea.vmem %s20_s13, 256  ;;  %p280_p4 = scmp.lt.s32.totalorder %s20_s13, %s20_s13 }
   0xc   :  { %p276_p3 = scmp.ne.s32.totalorder %s20_s13, %s275_s23  ;;  %p281_p5 = scmp.lt.s32.totalorder %s275_s23, %s275_s23 }
   0xe   :  { %p282_p6 = por %p281_p5, %p280_p4 }
  0x10   :  { %p283_p7 = pnand %p282_p6, %p276_p3 }
  0x12   :  { %286 = shalt.err (!%p283_p7)
}
  0x13   :  { %22 = dma.hbm_to_vmem [thread:$0]  %s452_s0, 256, %s20_s13, [#allocation3]  }
  0x14   :  { %s287_s28 = scalar_lea.hbm %s453_s1, 64 }
  0x15   :  { %p288_p8 = scmp.ne.s32.totalorder %s453_s1, %s287_s28  ;;  %p291_p9 = scmp.lt.u32.totalorder %s287_s28, %s453_s1 }
  0x17   :  { %p293_p10 = pnand %p291_p9, %p288_p8 }
  0x19   :  { %296 = shalt.err (!%p293_p10)
}
  0x1a   :  { %s297_s6 = scalar_lea.vmem %s30_s15, 64  ;;  %p302_p12 = scmp.lt.s32.totalorder %s30_s15, %s30_s15 }
  0x1b   :  { %p298_p11 = scmp.ne.s32.totalorder %s30_s15, %s297_s6  ;;  %p303_p13 = scmp.lt.s32.totalorder %s297_s6, %s297_s6 }
  0x1d   :  { %p304_p0 = por %p303_p13, %p302_p12 }
  0x1f   :  { %p305_p1 = pnand %p304_p0, %p298_p11 }
  0x21   :  { %308 = shalt.err (!%p305_p1)
}
  0x22   :  { %32 = dma.hbm_to_vmem [thread:$0]  %s453_s1, 64, %s30_s15, [#allocation6]  }
  0x23   :  { %353 = dma.done.wait [#allocation3], 256  }
  0x24   :  { %354 = vsyncadd [#allocation3], 4294967040 }
  0x25   :  { %355 = dma.done.wait [#allocation6], 64  }
  0x26   :  { %356 = vsyncadd [#allocation6], 4294967232  ;;  %vm43_vm0 = vcmask 0   ;;  %v363_v0 = vmov 0.0   ;;  %vm62_vm1 = vcmask 1043458   ;;  %v46_v1 = vld [vmem:[#allocation2] sm:$0xff]  ;;  %v110_v28 = vlaneseq }
  0x27   :  { %44 = vst.msk [vmem:[#allocation7] sm:$0x1] %vm43_vm0, %v363_v0  ;;  %45 = vst.msk [vmem:[#allocation8] sm:$0x1] %vm43_vm0, %v363_v0  ;;  %v47_v2 = vld [vmem:[#allocation2 + $0x8] sm:$0xff]  ;;  %v58_v3 = vcombine.high %v46_v1, %v46_v1  ;;  %v63_v5 = vsel %vm62_vm1, %v46_v1, -inf }
  0x28   :  { %v59_v4 = vcombine.high %v47_v2, %v47_v2  ;;  %v77_v6 = vsel %vm62_vm1, %v47_v2, -inf  ;;  %v64_v7 = vrot.slane %v63_v5, 4  ;;  %v364_v26 = vmov 1966171168   ;;  %v48_v50 = vld [vmem:[#allocation5] sm:$0xf] }
  0x29   :  { %v70_v8 = vsel %vm62_vm1, %v58_v3, -inf  ;;  %v78_v10 = vrot.slane %v77_v6, 4  ;;  %v108_v27 = vunpack.c.l.s4 %v364_v26  ;;  %v52_v33 = vrot.slane %v46_v1, 7  ;;  %s366_s1 = smov [#allocation7]   ;;  %s367_s10 = smov [#allocation8]  }
  0x2a   :  { %v71_v9 = vrot.slane %v70_v8, 4  ;;  %v84_v11 = vsel %vm62_vm1, %v59_v4, -inf  ;;  %v65_v12 = vmax.f32 %v63_v5, %v64_v7  ;;  %v53_v36 = vrot.slane %v47_v2, 7  ;;  %s226_s8 = sshll.u32 %s366_s1, 4  ;;  %s236_s11 = sshll.u32 %s367_s10, 4  ;;  %s227_s8 = int_to_ptr.vmem [resolvable:$true] %s226_s8  ;;  %s237_s11 = int_to_ptr.vmem [resolvable:$true] %s236_s11 }
  0x2b   :  { %v85_v13 = vrot.slane %v84_v11, 4  ;;  %v79_v15 = vmax.f32 %v77_v6, %v78_v10  ;;  %v109_v38 = vunpack.c.0.s8 %v108_v27  ;;  %v111_v39 = vshrl.u32 %v110_v28, 7  ;;  %s309_s13 = scalar_lea.vmem %s227_s8, 16  ;;  %s313_s14 = scalar_lea.vmem %s227_s8, 32 }
  0x2c   :  { %v72_v14 = vmax.f32 %v70_v8, %v71_v9  ;;  %v66_v16 = vrot.slane %v65_v12, 2  ;;  %vm56_vm2 = vcmp.gt.f32.partialorder %v46_v1, %v52_v33  ;;  %vm57_vm3 = vcmp.gt.f32.partialorder %v47_v2, %v53_v36  ;;  %p310_p2 = scmp.ne.s32.totalorder %s227_s8, %s309_s13  ;;  %p314_p3 = scmp.lt.s32.totalorder %s227_s8, %s227_s8 }
  0x2d   :  { %v86_v17 = vmax.f32 %v84_v11, %v85_v13  ;;  %v80_v19 = vrot.slane %v79_v15, 2  ;;  %v112_v44 = vsub.s32 %v109_v38, %v111_v39  ;;  %v365_v45 = vmov 0   ;;  %p315_p4 = scmp.lt.s32.totalorder %s313_s14, %s309_s13 }
  0x2e   :  { %v73_v18 = vrot.slane %v72_v14, 2  ;;  %v67_v20 = vmax.f32 %v65_v12, %v66_v16  ;;  %vm49_vm8 = vcmp.eq.s32.totalorder %v48_v50, 1  ;;  %v138_v53 = vsub.s32 0, %v111_v39 }
  0x2f   :  { %v87_v21 = vrot.slane %v86_v17, 2  ;;  %v81_v23 = vmax.f32 %v79_v15, %v80_v19  ;;  %v142_v54 = vsub.s32 1, %v111_v39  ;;  %v146_v55 = vsub.s32 2, %v111_v39  ;;  %p316_p5 = por %p315_p4, %p314_p3 }
  0x30   :  { %v74_v22 = vmax.f32 %v72_v14, %v73_v18  ;;  %v68_v24 = vrot.slane %v67_v20, 1  ;;  %v150_v56 = vsub.s32 3, %v111_v39  ;;  %vm156_vm11 = vcmask 1040384  }
  0x31   :  { %v88_v25 = vmax.f32 %v86_v17, %v87_v21  ;;  %v82_v30 = vrot.slane %v81_v23, 1  ;;  %p317_p6 = pnand %p316_p5, %p310_p2 }
  0x32   :  { %v75_v29 = vrot.slane %v74_v22, 1  ;;  %v69_v31 = vmax.f32 %v67_v20, %v68_v24 }
  0x33   :  { %v89_v32 = vrot.slane %v88_v25, 1  ;;  %v83_v35 = vmax.f32 %v81_v23, %v82_v30 }
  0x34   :  { %v76_v34 = vmax.f32 %v74_v22, %v75_v29 }
  0x35   :  { %v90_v37 = vmax.f32 %v88_v25, %v89_v32 }
  0x36   :  { %v95_v40 = vcombine.low %v69_v31, %v76_v34  ;;  %v132_v31 = vld [vmem:[#allocation7] sm:$0x1]  ;;  %v177_v34 = vld [vmem:[#allocation8] sm:$0x1] }
  0x37   :  { %v96_v41 = vcombine.low %v83_v35, %v90_v37 }
  0x38   :  { %v97_v42 = vrot.slane %v95_v40, 7 }
  0x39   :  { %v98_v43 = vrot.slane %v96_v41, 7 }
  0x3a   :  { %vm101_vm4 = vcmp.ge.f32.partialorder %v46_v1, %v97_v42 }
  0x3b   :  { %vm102_vm5 = vcmp.ge.f32.partialorder %v47_v2, %v98_v43  ;;  %vm103_vm6 = vmand %vm56_vm2, %vm101_vm4 }
  0x3c   :  { %vm104_vm7 = vmand %vm57_vm3, %vm102_vm5  ;;  %v105_v46 = vsel %vm103_vm6, 1, %v365_v45 }
  0x3d   :  { %v106_v47 = vsel %vm104_vm7, 1, %v365_v45  ;;  %v113_v48 = vrot.slane %v105_v46, %v112_v44 }
  0x3e   :  { %v120_v49 = vrot.slane %v106_v47, %v112_v44 }
  0x40   :  { %v121_v51 = vcombine.high %v113_v48, %v120_v49 }
  0x42   :  { %v128_v52 = vrot.slane %v121_v51, %v112_v44 }
  0x44   :  { %vm129_vm9 = vcmp.ne.s32.totalorder %v128_v52, 0 }
  0x45   :  { %vm130_vm10 = vmand %vm49_vm8, %vm129_vm9 }
  0x46   :  { %v250_v57 = vsel %vm130_vm10, 1.0, %v363_v0  ;;  %vm131_vm12 = vmor %vm49_vm8, %vm129_vm9 }
  0x47   :  { %v139_v58 = vrot.slane %v250_v57, %v138_v53  ;;  %v143_v59 = vrot.slane %v250_v57, %v142_v54  ;;  %v147_v60 = vrot.slane %v250_v57, %v146_v55  ;;  %v151_v61 = vrot.slane %v250_v57, %v150_v56 }
  0x48   :  { %v251_v62 = vsel %vm131_vm12, 1.0, %v363_v0 }
  0x49   :  { %v157_v63 = vsel %vm156_vm11, %v139_v58, 0.0  ;;  %v158_v1 = vsel %vm156_vm11, %v143_v59, 0.0  ;;  %v160_v2 = vsel %vm156_vm11, %v147_v60, 0.0  ;;  %v184_v4 = vrot.slane %v251_v62, %v138_v53 }
  0x4a   :  { %v159_v3 = vadd.f32 %v158_v1, %v157_v63  ;;  %v188_v5 = vrot.slane %v251_v62, %v142_v54  ;;  %v192_v6 = vrot.slane %v251_v62, %v146_v55  ;;  %v162_v7 = vsel %vm156_vm11, %v151_v61, 0.0 }
  0x4b   :  { %v196_v8 = vrot.slane %v251_v62, %v150_v56  ;;  %v201_v10 = vsel %vm156_vm11, %v184_v4, 0.0 }
  0x4c   :  { %v161_v9 = vadd.f32 %v160_v2, %v159_v3  ;;  %v202_v11 = vsel %vm156_vm11, %v188_v5, 0.0  ;;  %v204_v0 = vsel %vm156_vm11, %v192_v6, 0.0 }
  0x4d   :  { %v203_v12 = vadd.f32 %v202_v11, %v201_v10  ;;  %v206_v14 = vsel %vm156_vm11, %v196_v8, 0.0 }
  0x4e   :  { %v163_v13 = vadd.f32 %v162_v7, %v161_v9 }
  0x4f   :  { %v205_v15 = vadd.f32 %v204_v0, %v203_v12 }
  0x50   :  { %164 = vadd.xlane.f32.xlu0 %v163_v13 }
  0x51   :  { %v207_v16 = vadd.f32 %v206_v14, %v205_v15 }
  0x54   :  { %208 = vadd.xlane.f32.xlu0 %v207_v16 }
  0xdd   :  { %v165_v17 = vpop.xlane.xlu0 %164 }
  0xde   :  { %v166_v18 = vrot.slane %v165_v17, 4 }
  0xe0   :  { %v167_v19 = vadd.f32 %v166_v18, %v165_v17 }
  0xe1   :  { %v209_v20 = vpop.xlane.xlu0 %208 }
  0xe2   :  { %v168_v21 = vrot.slane %v167_v19, 2  ;;  %v210_v22 = vrot.slane %v209_v20, 4 }
  0xe4   :  { %v211_v23 = vadd.f32 %v210_v22, %v209_v20  ;;  %v169_v24 = vadd.f32 %v168_v21, %v167_v19 }
  0xe6   :  { %v212_v25 = vrot.slane %v211_v23, 2  ;;  %v170_v26 = vrot.slane %v169_v24, 1 }
  0xe8   :  { %v213_v27 = vadd.f32 %v212_v25, %v211_v23  ;;  %v171_v28 = vadd.f32 %v170_v26, %v169_v24 }
  0xea   :  { %252 = vpush %v171_v28  ;;  %v214_v29 = vrot.slane %v213_v27, 1 }
  0xec   :  { %v215_v30 = vadd.f32 %v214_v29, %v213_v27 }
  0xee   :  { %254 = vpush %v215_v30 }
 0x11b   :  { %s253_s9 = spop %252 }
 0x11c   :  { %v173_v32 = vstv %s253_s9 }
 0x11d   :  { %v174_v33 = vadd.f32 %v173_v32, %v132_v31 }
 0x11f   :  { %176 = vst.msk [vmem:[#allocation7] sm:$0x1] %vm43_vm0, %v174_v33  ;;  %s255_s12 = spop %254 }
 0x120   :  { %v217_v35 = vstv %s255_s12 }
 0x121   :  { %320 = shalt.err (!%p317_p6)
}
 0x122   :  { %s321_s17 = scalar_lea.hbm %s454_s2, 16 }
 0x123   :  { %p322_p7 = scmp.ne.s32.totalorder %s454_s2, %s321_s17  ;;  %p325_p8 = scmp.lt.u32.totalorder %s321_s17, %s454_s2 }
 0x125   :  { %p327_p9 = pnand %p325_p8, %p322_p7 }
 0x127   :  { %330 = shalt.err (!%p327_p9)
}
 0x128   :  { %229 = dma.vmem_to_hbm [thread:$0]  %s227_s8, 16, %s454_s2, [#allocation4]   ;;  %v218_v36 = vadd.f32 %v217_v35, %v177_v34 }
 0x129   :  { %s331_s24 = scalar_lea.vmem %s237_s11, 16  ;;  %s335_s25 = scalar_lea.vmem %s237_s11, 32 }
 0x12a   :  { %219 = vst.msk [vmem:[#allocation8] sm:$0x1] %vm43_vm0, %v218_v36  ;;  %p332_p10 = scmp.ne.s32.totalorder %s237_s11, %s331_s24  ;;  %p336_p11 = scmp.lt.s32.totalorder %s237_s11, %s237_s11 }
 0x12b   :  { %p337_p12 = scmp.lt.s32.totalorder %s335_s25, %s331_s24 }
 0x12d   :  { %p338_p13 = por %p337_p12, %p336_p11 }
 0x12f   :  { %p339_p0 = pnand %p338_p13, %p332_p10 }
 0x131   :  { %342 = shalt.err (!%p339_p0)
}
 0x132   :  { %s343_s28 = scalar_lea.hbm %s455_s3, 16 }
 0x133   :  { %p344_p1 = scmp.ne.s32.totalorder %s455_s3, %s343_s28  ;;  %p347_p2 = scmp.lt.u32.totalorder %s343_s28, %s455_s3 }
 0x135   :  { %p349_p3 = pnand %p347_p2, %p344_p1 }
 0x137   :  { %352 = shalt.err (!%p349_p3)
}
 0x138   :  { %239 = dma.vmem_to_hbm [thread:$0]  %s237_s11, 16, %s455_s3, [#allocation9]  }
 0x139   :  { %357 = dma.done.wait [#allocation4], 16  }
 0x13a   :  { %358 = vsyncadd [#allocation4], 4294967280 }
 0x13b   :  { %359 = dma.done.wait [#allocation9], 16  }
 0x13c   :  { %360 = vsyncadd [#allocation9], 4294967280 }
 0x13d   :  { %246 = vsyncpa [#allocation3], 1 }
 0x13e   :  { %247 = vsyncpa [#allocation6], 1 }
 0x13f   :  { %248 = vsyncpa [#allocation4], 1 }
 0x140   :  { %249 = vsyncpa [#allocation9], 1 }

</bundles_post_ra>
